<compile_context>
chip_gen: v7x
topology: tpu7x:2x2x1
jax: 0.10.0
libtpu: 0.0.40
codegen_flags: <defaults>
</compile_context>

<pallas_src>
import functools
import math
import numpy as np

import jax
import jax.numpy as jnp
from jax import lax
from jax.experimental import pallas as pl
from jax.experimental.pallas import tpu as pltpu

EPS = 1e-12
_LANES = 128
_MAX_ROW_TILE = 256            # keeps (row_tile, 128) f32 partials <= 128 KiB each
_CHUNK_ELEM_BUDGET = 8192      # elements loaded per chunk per array (~8 vregs f32)
_TEN_OVER_LN10 = 10.0 / math.log(10.0)


def _round_up(x, m):
    return -(-x // m) * m


def _cdiv(a, b):
    return -(-a // b)


def _tpu_vmem_bytes():
    """Physical VMEM per core; conservative 64 MiB fallback (v7x-safe)."""
    try:
        info = pltpu.get_tpu_info()
    except Exception:
        return 64 * 1024 * 1024
    for name in ("vmem_capacity_bytes", "vmem_bytes", "vmem_size_bytes"):
        v = getattr(info, name, None)
        if isinstance(v, (int, np.integer)) and int(v) > 0:
            return int(v)
    return 64 * 1024 * 1024


def _budget():
    """Generation-aware (target_block_bytes, vmem_limit_bytes)."""
    vmem = _tpu_vmem_bytes()
    if vmem >= 96 * 1024 * 1024:                 # v5e / v6e: 128 MiB physical
        return 8 * 1024 * 1024, 80 * 1024 * 1024
    return 6 * 1024 * 1024, 52 * 1024 * 1024     # v7x (64 MiB) or unknown


def _neg_sisdr_kernel(x_ref, t_ref, o_ref, xt_ref, tt_ref, xx_ref, *,
                      min_val, eps, chunk, n_chunks, n_t_steps, t_rem):
    """Fused single-pass negative SI-SDR over the time (lane) axis.

    x_ref, t_ref : (row_tile, t_tile) input tiles, t_tile == n_chunks * chunk.
    o_ref        : (row_tile, 1) per-row loss, written on the last T step only.
    xt/tt/xx_ref : (row_tile, 128) f32 lane-partial accumulators persisting
                   across the T ("arbitrary") grid axis (unused if n_t_steps==1).
    t_rem        : static T % t_tile; nonzero => the last T tile overhangs and
                   only its first t_rem lanes are valid.
    """
    rows = x_ref.shape[0]
    groups = chunk // _LANES

    def _accum_chunk(carry, start, valid_lanes):
        xt, tt, xx = carry
        if not isinstance(start, int):
            start = pl.multiple_of(start, _LANES)
        x = x_ref[:, pl.ds(start, chunk)].astype(jnp.float32)
        t = t_ref[:, pl.ds(start, chunk)].astype(jnp.float32)
        if valid_lanes < chunk:
            # Only the partial tail chunk of the LAST T tile pays this (VPU) tax.
            lane = lax.broadcasted_iota(jnp.int32, (rows, chunk), 1)
            ok = lane < valid_lanes
            x = jnp.where(ok, x, 0.0)
            t = jnp.where(ok, t, 0.0)
        pxt = x * t
        ptt = t * t
        pxx = x * x
        for g in range(groups):                      # pure VALU folds into 128 lanes
            sl = slice(g * _LANES, (g + 1) * _LANES)
            xt = xt + pxt[:, sl]
            tt = tt + ptt[:, sl]
            xx = xx + pxx[:, sl]
        return xt, tt, xx

    def _run(carry, n_full, tail_valid):
        # n_full fully-valid chunks, then optionally one masked tail chunk;
        # remaining (garbage-only) chunks of the block overhang are skipped.
        if n_full > 0:
            if n_full <= 8:
                for c in range(n_full):
                    carry = _accum_chunk(carry, c * chunk, chunk)
            else:
                carry = lax.fori_loop(
                    0, n_full,
                    lambda c, acc: _accum_chunk(acc, c * chunk, chunk),
                    carry, unroll=4)
        if tail_valid:
            carry = _accum_chunk(carry, n_full * chunk, tail_valid)
        return carry

    def _finalize(carry):
        xt = jnp.sum(carry[0], axis=-1, keepdims=True)
        tt = jnp.sum(carry[1], axis=-1, keepdims=True)
        xx = jnp.sum(carry[2], axis=-1, keepdims=True)
        alpha = xt / (tt + eps)
        a2tt = alpha * alpha * tt
        num = a2tt + eps
        den = jnp.maximum(xx - 2.0 * alpha * xt + a2tt, 0.0) + eps
        loss = _TEN_OVER_LN10 * (jnp.log(den) - jnp.log(num))
        if min_val is not None:
            loss = jnp.maximum(loss, jnp.float32(min_val))
        o_ref[...] = loss

    if t_rem:
        last_full, last_tail = t_rem // chunk, t_rem % chunk
    else:
        last_full, last_tail = n_chunks, 0

    if n_t_steps == 1:
        z = jnp.zeros((rows, _LANES), jnp.float32)
        _finalize(_run((z, z, z), last_full, last_tail))
    else:
        k = pl.program_id(1)

        @pl.when(k == 0)
        def _init():
            xt_ref[...] = jnp.zeros_like(xt_ref)
            tt_ref[...] = jnp.zeros_like(tt_ref)
            xx_ref[...] = jnp.zeros_like(xx_ref)

        @pl.when(k < n_t_steps - 1)
        def _full_tiles():                      # unmasked accumulate, no finalize
            acc = _run((xt_ref[...], tt_ref[...], xx_ref[...]), n_chunks, 0)
            xt_ref[...] = acc[0]
            tt_ref[...] = acc[1]
            xx_ref[...] = acc[2]

        @pl.when(k == n_t_steps - 1)
        def _last_tile():                       # masked tail (if any) + finalize
            acc = _run((xt_ref[...], tt_ref[...], xx_ref[...]),
                       last_full, last_tail)
            _finalize(acc)


def _choose_tiles(n_rows, t_len, itemsize, target_block_bytes):
    """Pick (row_tile, t_tile, chunk).

    row_tile : sublane-aligned (dtype-aware), capped so lane-partial accumulators
               stay tiny, and halved (when rows allow) so the "parallel" row axis
               has >= 2 steps (v7x megacore + overlap).
    t_tile   : multiple of `chunk`, ~target_block_bytes per input block, balanced
               so the last T tile is not mostly overhang.  Long non-128-aligned T
               is tiled too (last tile lane-masked in the kernel).
    chunk    : in-kernel lane-chunk (multiple of 128, <= 512) bounding live vregs.
    """
    sub = max(8, 32 // itemsize)                 # f32: 8, bf16: 16, int8/fp8: 32
    row_cap = _round_up(n_rows, sub)
    t_pad = _round_up(t_len, _LANES)

    row_tile = min(row_cap, _MAX_ROW_TILE)
    if row_cap > sub:
        row_tile = min(row_tile, _round_up(_cdiv(row_cap, 2), sub))
    row_tile = max(row_tile, sub)
    n_row_tiles = _cdiv(row_cap, row_tile)

    chunk_cap = (_CHUNK_ELEM_BUDGET // row_tile) // _LANES * _LANES
    chunk_cap = int(min(max(chunk_cap, _LANES), 512))
    lane_budget = (target_block_bytes // (row_tile * itemsize)) // _LANES * _LANES
    lane_budget = max(lane_budget, _LANES)

    single_tile_ok = t_pad <= lane_budget and not (
        n_row_tiles == 1 and t_pad >= 2 * chunk_cap)
    if single_tile_ok:
        # Whole (128-padded) time axis in one T tile: largest chunk dividing t_pad
        # so the block only overhangs T by the usual <128-lane padding.
        chunk = _LANES
        for cand in (512, 384, 256):
            if cand <= chunk_cap and t_pad % cand == 0:
                chunk = cand
                break
        t_tile = t_pad
    else:
        chunk = min(chunk_cap, lane_budget)
        t_tile_max = max((min(lane_budget, t_pad) // chunk) * chunk, chunk)
        n_t = _cdiv(t_pad, t_tile_max)
        if n_row_tiles == 1:
            n_t = max(n_t, 2)       # keep DMA/compute overlapped with one row tile
        t_tile = _round_up(_cdiv(t_pad, n_t), chunk)
    return row_tile, int(t_tile), int(chunk)


def _per_element_loss(x2d, t2d, *, min_val, eps, target_block_bytes,
                      vmem_limit_bytes):
    """Run the Pallas kernel on (N, T) rows, returning (N,) per-row losses."""
    n, t_len = x2d.shape
    itemsize = x2d.dtype.itemsize
    row_tile, t_tile, chunk = _choose_tiles(n, t_len, itemsize, target_block_bytes)

    n_row_tiles = _cdiv(n, row_tile)
    n_t_tiles = _cdiv(t_len, t_tile)
    t_rem = t_len % t_tile            # static; nonzero => mask last T tile
    row_up = n_row_tiles * row_tile
    n_chunks = t_tile // chunk

    kernel = functools.partial(
        _neg_sisdr_kernel, min_val=min_val, eps=eps, chunk=chunk,
        n_chunks=n_chunks, n_t_steps=n_t_tiles, t_rem=t_rem)

    out = pl.pallas_call(
        kernel,
        out_shape=jax.ShapeDtypeStruct((row_up, 1), jnp.float32),
        grid_spec=pltpu.PrefetchScalarGridSpec(
            num_scalar_prefetch=0,
            grid=(n_row_tiles, n_t_tiles),
            in_specs=[
                pl.BlockSpec((row_tile, t_tile), lambda i, k: (i, k)),
                pl.BlockSpec((row_tile, t_tile), lambda i, k: (i, k)),
            ],
            out_specs=pl.BlockSpec((row_tile, 1), lambda i, k: (i, 0)),
            scratch_shapes=[
                pltpu.VMEM((row_tile, _LANES), jnp.float32),   # xt lane-partials
                pltpu.VMEM((row_tile, _LANES), jnp.float32),   # tt lane-partials
                pltpu.VMEM((row_tile, _LANES), jnp.float32),   # xx lane-partials
            ],
        ),
        compiler_params=pltpu.CompilerParams(
            dimension_semantics=("parallel", "arbitrary"),
            vmem_limit_bytes=vmem_limit_bytes,
        ),
    )(x2d, t2d)
    return out[:n, 0]


def clipped_neg_sisdr(inp, target, *, min_val=None, reduction="mean",
                      eps=EPS, batch_mean=True,
                      target_block_bytes=None, vmem_limit_bytes=None):
    """JAX/Pallas equivalent of ClippedNegSISDR.forward."""
    n_dims = inp.ndim
    assert n_dims in (2, 3, 4), (
        "Only 2D or 3D or 4D tensor is acceptable, but given "
        f"{n_dims}D tensor.")
    if reduction not in ("mean", "sum", None):
        raise ValueError("Invalid reduction type")

    if target.dtype != inp.dtype:
        target = target.astype(inp.dtype)

    if target_block_bytes is None or vmem_limit_bytes is None:
        tb, vl = _budget()
        target_block_bytes = target_block_bytes or tb
        vmem_limit_bytes = vmem_limit_bytes or vl

    t_len = inp.shape[-1]
    lead = inp.shape[:-1]
    n_rows = int(np.prod(lead))

    x2d = inp.reshape(n_rows, t_len)
    t2d = target.reshape(n_rows, t_len)

    loss = _per_element_loss(x2d, t2d, min_val=min_val, eps=eps,
                             target_block_bytes=target_block_bytes,
                             vmem_limit_bytes=vmem_limit_bytes)
    loss = loss.reshape(lead)  # (B,), (B, C) or (B, C, M)

    if reduction:
        if n_dims == 3:
            loss = loss.mean(axis=1) if reduction == "mean" else loss.sum(axis=1)
        elif n_dims == 4:
            if reduction == "mean":
                loss = loss.mean(axis=(1, 2))
            else:
                loss = loss.sum(axis=(1, 2))
    if batch_mean:
        loss = loss.mean(axis=0)
    return loss


def _reference(inp, target, *, min_val=None, reduction="mean",
               eps=EPS, batch_mean=True):
    """Pure-JAX reference mirroring the PyTorch module exactly (f32)."""
    inp = inp.astype(jnp.float32)
    target = target.astype(jnp.float32)
    n_dims = inp.ndim
    alpha = jnp.sum(inp * target, axis=-1, keepdims=True) / (
        jnp.sum(target ** 2, axis=-1, keepdims=True) + eps)
    num = jnp.sum((alpha * target) ** 2, axis=-1) + eps
    den = jnp.sum((alpha * target - inp) ** 2, axis=-1) + eps
    loss = -10.0 * jnp.log10(num / den)
    if min_val is not None:
        loss = jnp.maximum(loss, min_val)
    if reduction:
        if n_dims == 3:
            loss = loss.mean(axis=1) if reduction == "mean" else loss.sum(axis=1)
        elif n_dims == 4:
            loss = loss.mean(axis=(1, 2)) if reduction == "mean" else loss.sum(axis=(1, 2))
    if batch_mean:
        loss = loss.mean(axis=0)
    return loss


def _check(out, ref):
    np.testing.assert_allclose(np.asarray(out), np.asarray(ref),
                               rtol=1e-4, atol=1e-4)


if __name__ == "__main__":
    key = jax.random.PRNGKey(0)
    keys = jax.random.split(key, 10)

    # 1) Module default config (min=None, reduction='mean', batch_mean=True), 3D.
    x = jax.random.normal(keys[0], (2, 4, 256), dtype=jnp.float32)
    t = jax.random.normal(keys[1], (2, 4, 256), dtype=jnp.float32)
    out = jax.block_until_ready(clipped_neg_sisdr(x, t))
    _check(out, _reference(x, t))

    # 2) 4D, clipping + 'sum', non-128-aligned T, forced tiny block budget to
    #    exercise multi-T-tile accumulation, last-step lane masking, row overhang.
    x4 = jax.random.normal(keys[2], (3, 2, 5, 500), dtype=jnp.float32)
    t4 = jax.random.normal(keys[3], (3, 2, 5, 500), dtype=jnp.float32)
    out4 = jax.block_until_ready(
        clipped_neg_sisdr(x4, t4, min_val=26.0, reduction="sum",
                          batch_mean=False, target_block_bytes=8192))
    _check(out4, _reference(x4, t4, min_val=26.0, reduction="sum",
                            batch_mean=False))

    # 3) 2D, short non-lane-aligned T (single masked chunk, row overhang).
    x2 = jax.random.normal(keys[4], (4, 200), dtype=jnp.float32)
    t2 = jax.random.normal(keys[5], (4, 200), dtype=jnp.float32)
    out2 = jax.block_until_ready(clipped_neg_sisdr(x2, t2))
    _check(out2, _reference(x2, t2))

    # 4) Longer non-aligned T: exercises the fori_loop chunked path + masked tail.
    xl = jax.random.normal(keys[6], (2, 8, 16001), dtype=jnp.float32)
    tl = jax.random.normal(keys[7], (2, 8, 16001), dtype=jnp.float32)
    outl = jax.block_until_ready(clipped_neg_sisdr(xl, tl))
    _check(outl, _reference(xl, tl))

    # 5) bf16 inputs: dtype-aware tiling (16-row sublane tiles), f32 accumulation.
    xb = jax.random.normal(keys[8], (2, 3, 640), dtype=jnp.float32).astype(jnp.bfloat16)
    tb = jax.random.normal(keys[9], (2, 3, 640), dtype=jnp.float32).astype(jnp.bfloat16)
    outb = jax.block_until_ready(clipped_neg_sisdr(xb, tb))
    _check(outb, _reference(xb, tb))

    print("KERNEL_OK")
</pallas_src>

<mosaic_0001>
module attributes {stable_mosaic.version = 11 : i64} {
  func.func @_neg_sisdr_kernel(%arg0: i32, %arg1: i32, %arg2: memref<8x256xf32, #tpu.memory_space<vmem>>, %arg3: memref<8x256xf32, #tpu.memory_space<vmem>>, %arg4: memref<8x1xf32, #tpu.memory_space<vmem>>, %arg5: memref<8x128xf32, #tpu.memory_space<vmem>>, %arg6: memref<8x128xf32, #tpu.memory_space<vmem>>, %arg7: memref<8x128xf32, #tpu.memory_space<vmem>>) attributes {dimension_semantics = [#tpu.dimension_semantics<parallel>, #tpu.dimension_semantics<arbitrary>], iteration_bounds = array<i64: 1, 1>, scalar_prefetch = 0 : i64, scratch_operands = 3 : i64, tpu.core_type = #tpu.core_type<tc>, window_params = [{transform_indices = @transform_0, window_bounds = array<i64: 8, 256>}, {transform_indices = @transform_1, window_bounds = array<i64: 8, 256>}, {transform_indices = @transform_2, window_bounds = array<i64: 8, 1>}]} {
    %cst = arith.constant 0.000000e+00 : f32
    %0 = vector.broadcast %cst : f32 to vector<8x128xf32>
    %c0 = arith.constant 0 : index
    %c0_0 = arith.constant 0 : index
    %1 = vector.load %arg2[%c0, %c0_0] : memref<8x256xf32, #tpu.memory_space<vmem>>, vector<8x256xf32>
    %c0_1 = arith.constant 0 : index
    %c0_2 = arith.constant 0 : index
    %2 = vector.load %arg3[%c0_1, %c0_2] : memref<8x256xf32, #tpu.memory_space<vmem>>, vector<8x256xf32>
    %3 = arith.mulf %1, %2 : vector<8x256xf32>
    %4 = arith.mulf %2, %2 : vector<8x256xf32>
    %5 = arith.mulf %1, %1 : vector<8x256xf32>
    %6 = vector.extract_strided_slice %3 {offsets = [0, 0], sizes = [8, 128], strides = [1, 1]} : vector<8x256xf32> to vector<8x128xf32>
    %7 = arith.addf %0, %6 : vector<8x128xf32>
    %8 = vector.extract_strided_slice %4 {offsets = [0, 0], sizes = [8, 128], strides = [1, 1]} : vector<8x256xf32> to vector<8x128xf32>
    %9 = arith.addf %0, %8 : vector<8x128xf32>
    %10 = vector.extract_strided_slice %5 {offsets = [0, 0], sizes = [8, 128], strides = [1, 1]} : vector<8x256xf32> to vector<8x128xf32>
    %11 = arith.addf %0, %10 : vector<8x128xf32>
    %12 = vector.extract_strided_slice %3 {offsets = [0, 128], sizes = [8, 128], strides = [1, 1]} : vector<8x256xf32> to vector<8x128xf32>
    %13 = arith.addf %7, %12 : vector<8x128xf32>
    %14 = vector.extract_strided_slice %4 {offsets = [0, 128], sizes = [8, 128], strides = [1, 1]} : vector<8x256xf32> to vector<8x128xf32>
    %15 = arith.addf %9, %14 : vector<8x128xf32>
    %16 = vector.extract_strided_slice %5 {offsets = [0, 128], sizes = [8, 128], strides = [1, 1]} : vector<8x256xf32> to vector<8x128xf32>
    %17 = arith.addf %11, %16 : vector<8x128xf32>
    %cst_3 = arith.constant dense<0.000000e+00> : vector<8xf32>
    %18 = vector.multi_reduction <add>, %13, %cst_3 [1] : vector<8x128xf32> to vector<8xf32>
    %19 = vector.shape_cast %18 : vector<8xf32> to vector<8x1xf32>
    %cst_4 = arith.constant dense<0.000000e+00> : vector<8xf32>
    %20 = vector.multi_reduction <add>, %15, %cst_4 [1] : vector<8x128xf32> to vector<8xf32>
    %21 = vector.shape_cast %20 : vector<8xf32> to vector<8x1xf32>
    %cst_5 = arith.constant dense<0.000000e+00> : vector<8xf32>
    %22 = vector.multi_reduction <add>, %17, %cst_5 [1] : vector<8x128xf32> to vector<8xf32>
    %23 = vector.shape_cast %22 : vector<8xf32> to vector<8x1xf32>
    %cst_6 = arith.constant 9.99999996E-13 : f32
    %24 = vector.broadcast %cst_6 : f32 to vector<8x1xf32>
    %25 = arith.addf %21, %24 : vector<8x1xf32>
    %26 = arith.divf %19, %25 : vector<8x1xf32>
    %27 = arith.mulf %26, %26 : vector<8x1xf32>
    %28 = arith.mulf %27, %21 : vector<8x1xf32>
    %cst_7 = arith.constant 9.99999996E-13 : f32
    %29 = vector.broadcast %cst_7 : f32 to vector<8x1xf32>
    %30 = arith.addf %28, %29 : vector<8x1xf32>
    %cst_8 = arith.constant 2.000000e+00 : f32
    %31 = vector.broadcast %cst_8 : f32 to vector<8x1xf32>
    %32 = arith.mulf %31, %26 : vector<8x1xf32>
    %33 = arith.mulf %32, %19 : vector<8x1xf32>
    %34 = arith.subf %23, %33 : vector<8x1xf32>
    %35 = arith.addf %34, %28 : vector<8x1xf32>
    %cst_9 = arith.constant 0.000000e+00 : f32
    %36 = vector.broadcast %cst_9 : f32 to vector<8x1xf32>
    %37 = arith.maximumf %35, %36 : vector<8x1xf32>
    %cst_10 = arith.constant 9.99999996E-13 : f32
    %38 = vector.broadcast %cst_10 : f32 to vector<8x1xf32>
    %39 = arith.addf %37, %38 : vector<8x1xf32>
    %40 = math.log %39 : vector<8x1xf32>
    %41 = math.log %30 : vector<8x1xf32>
    %42 = arith.subf %40, %41 : vector<8x1xf32>
    %cst_11 = arith.constant 4.34294462 : f32
    %43 = vector.broadcast %cst_11 : f32 to vector<8x1xf32>
    %44 = arith.mulf %43, %42 : vector<8x1xf32>
    %c0_12 = arith.constant 0 : index
    %c0_13 = arith.constant 0 : index
    %45 = vector.load %arg4[%c0_12, %c0_13] : memref<8x1xf32, #tpu.memory_space<vmem>>, vector<8x1xf32>
    tpu.vector_store %arg4[%c0_12, %c0_13], %44 {strides = array<i32>} : memref<8x1xf32, #tpu.memory_space<vmem>>, vector<8x1xf32>,
    return
  }
  func.func @transform_0(%arg0: i32, %arg1: i32) -> (i32, i32) {
    %c0_i32 = arith.constant 0 : i32
    return %arg0, %arg1 : i32, i32
  }
  func.func @transform_1(%arg0: i32, %arg1: i32) -> (i32, i32) {
    %c0_i32 = arith.constant 0 : i32
    return %arg0, %arg1 : i32, i32
  }
  func.func @transform_2(%arg0: i32, %arg1: i32) -> (i32, i32) {
    %c0_i32 = arith.constant 0 : i32
    %c0_i32_0 = arith.constant 0 : i32
    return %arg0, %c0_i32 : i32, i32
  }
}

</mosaic_0001>

<bundles_post_ra>
// kernel: tpu_custom_call.1
= control target key start
LH: loop header
LB: loop body
LE: loop exit
PB: predicated region body
PF: predicated region fallthrough
CT: control target
= control target key end

     0   :  { %7 = vsyncpa [#allocation6], 0  ;;  %s183_s0 = inlined_call_operand.hbm [shape: f32[8,256], index: 0, kind: input, shape index: {}]   ;;  %s184_s1 = inlined_call_operand.hbm [shape: f32[8,256], index: 1, kind: input, shape index: {}]   ;;  %s185_s2 = inlined_call_operand.vmem [shape: f32[8,1], index: 2, kind: output, shape index: {}]  }
   0x1   :  { %8 = vsyncpa [#allocation8], 0  ;;  %s139_s9 = smov [#allocation5]   ;;  %s140_s11 = smov [#allocation7]  }
   0x2   :  { %s15_s10 = sshll.u32 %s139_s9, 4  ;;  %s25_s12 = sshll.u32 %s140_s11, 4  ;;  %s16_s10 = int_to_ptr.vmem [resolvable:$true] %s15_s10  ;;  %s26_s12 = int_to_ptr.vmem [resolvable:$true] %s25_s12 }
   0x3   :  { %s91_s15 = scalar_lea.hbm %s183_s0, 256 }
   0x4   :  { %p92_p0 = scmp.ne.s32.totalorder %s183_s0, %s91_s15  ;;  %p95_p1 = scmp.lt.u32.totalorder %s91_s15, %s183_s0 }
   0x6   :  { %p97_p2 = pnand %p95_p1, %p92_p0 }
   0x8   :  { %100 = shalt.err (!%p97_p2)
}
   0x9   :  { %s101_s20 = scalar_lea.vmem %s16_s10, 256  ;;  %p106_p4 = scmp.lt.s32.totalorder %s16_s10, %s16_s10 }
   0xa   :  { %p102_p3 = scmp.ne.s32.totalorder %s16_s10, %s101_s20  ;;  %p107_p5 = scmp.lt.s32.totalorder %s101_s20, %s101_s20 }
   0xc   :  { %p108_p6 = por %p107_p5, %p106_p4 }
   0xe   :  { %p109_p7 = pnand %p108_p6, %p102_p3 }
  0x10   :  { %112 = shalt.err (!%p109_p7)
}
  0x11   :  { %18 = dma.hbm_to_vmem [thread:$0]  %s183_s0, 256, %s16_s10, [#allocation6]  }
  0x12   :  { %s113_s25 = scalar_lea.hbm %s184_s1, 256 }
  0x13   :  { %p114_p8 = scmp.ne.s32.totalorder %s184_s1, %s113_s25  ;;  %p117_p9 = scmp.lt.u32.totalorder %s113_s25, %s184_s1 }
  0x15   :  { %p119_p10 = pnand %p117_p9, %p114_p8 }
  0x17   :  { %122 = shalt.err (!%p119_p10)
}
  0x18   :  { %s123_s30 = scalar_lea.vmem %s26_s12, 256  ;;  %p128_p12 = scmp.lt.s32.totalorder %s26_s12, %s26_s12 }
  0x19   :  { %p124_p11 = scmp.ne.s32.totalorder %s26_s12, %s123_s30  ;;  %p129_p13 = scmp.lt.s32.totalorder %s123_s30, %s123_s30 }
  0x1b   :  { %p130_p0 = por %p129_p13, %p128_p12 }
  0x1d   :  { %p131_p1 = pnand %p130_p0, %p124_p11 }
  0x1f   :  { %134 = shalt.err (!%p131_p1)
}
  0x20   :  { %28 = dma.hbm_to_vmem [thread:$0]  %s184_s1, 256, %s26_s12, [#allocation8]  }
  0x21   :  { %135 = dma.done.wait [#allocation6], 256  }
  0x22   :  { %136 = vsyncadd [#allocation6], 4294967040 }
  0x23   :  { %137 = dma.done.wait [#allocation8], 256  }
  0x24   :  { %138 = vsyncadd [#allocation8], 4294967040  ;;  %v37_v0 = vld [vmem:[#allocation7] sm:$0xff]  ;;  %v38_v1 = vld [vmem:[#allocation7 + $0x8] sm:$0xff]  ;;  %vm75_vm0 = vcmask 7168  }
  0x25   :  { %v35_v2 = vld [vmem:[#allocation5] sm:$0xff]  ;;  %v41_v3 = vmul.f32 %v37_v0, %v37_v0  ;;  %v42_v4 = vmul.f32 %v38_v1, %v38_v1  ;;  %v36_v5 = vld [vmem:[#allocation5 + $0x8] sm:$0xff] }
  0x26   :  { %v39_v6 = vmul.f32 %v37_v0, %v35_v2  ;;  %v43_v7 = vmul.f32 %v35_v2, %v35_v2  ;;  %v40_v8 = vmul.f32 %v38_v1, %v36_v5  ;;  %v44_v9 = vmul.f32 %v36_v5, %v36_v5 }
  0x27   :  { %v49_v10 = vadd.f32 %v42_v4, %v41_v3 }
  0x28   :  { %v50_v11 = vadd.f32 %v44_v9, %v43_v7  ;;  %v48_v12 = vadd.f32 %v40_v8, %v39_v6 }
  0x29   :  { %53 = vadd.xlane.f32.xlu0 %v49_v10 }
  0x2a   :  { %55 = vadd.xlane.f32.xlu1 %v50_v11 }
  0x2d   :  { %51 = vadd.xlane.f32.xlu0 %v48_v12 }
  0xb6   :  { %v54_v13 = vpop.xlane.xlu0 %53 }
  0xb7   :  { %v57_v14 = vadd.f32 1e-12, %v54_v13  ;;  %v56_v20 = vpop.xlane.xlu1 %55 }
  0xb9   :  { %85 = vrcp.f32 %v57_v14 }
  0xba   :  { %v52_v15 = vpop.xlane.xlu0 %51 }
  0xc3   :  { %v86_v16 = vpop.eup %85 }
  0xc4   :  { %v59_v17 = vmul.f32 %v86_v16, %v52_v15 }
  0xc6   :  { %v60_v18 = vmul.f32 %v59_v17, %v59_v17  ;;  %v63_v19 = vmul.f32 2.0, %v59_v17 }
  0xc8   :  { %v64_v21 = vmul.f32 %v63_v19, %v52_v15  ;;  %v61_v22 = vmul.f32 %v60_v18, %v54_v13 }
  0xca   :  { %v65_v23 = vsub.f32 %v56_v20, %v64_v21  ;;  %v62_v24 = vadd.f32 1e-12, %v61_v22 }
  0xcc   :  { %v66_v25 = vadd.f32 %v65_v23, %v61_v22  ;;  %87 = vlog2.f32 %v62_v24 }
  0xce   :  { %v67_v26 = vmax.f32 %v66_v25, 0.0 }
  0xd0   :  { %v68_v27 = vadd.f32 1e-12, %v67_v26 }
  0xd2   :  { %89 = vlog2.f32 %v68_v27 }
  0xd6   :  { %v88_v28 = vpop.eup %87 }
  0xd7   :  { %v72_v31 = vmul.f32 0.6931472, %v88_v28 }
  0xdc   :  { %v90_v29 = vpop.eup %89 }
  0xdd   :  { %v70_v30 = vmul.f32 0.6931472, %v90_v29 }
  0xdf   :  { %v73_v32 = vsub.f32 %v70_v30, %v72_v31 }
  0xe1   :  { %v74_v33 = vmul.f32 4.3429446, %v73_v32 }
  0xe3   :  { %76 = vst.msk [vmem:[%s185_s2] sm:$0xff] %vm75_vm0, %v74_v33 }
  0xe4   :  { %81 = vsyncpa [#allocation6], 1 }
  0xe5   :  { %82 = vsyncpa [#allocation8], 1 }

</bundles_post_ra>
